<compile_context>
chip_gen: v5e
topology: v5e:2x2
jax: 0.10.0
libtpu: 0.0.40
codegen_flags: <defaults>
</compile_context>

<pallas_src>
import jax
import jax.numpy as jnp
from jax.experimental import pallas as pl
from jax.experimental.pallas import tpu as pltpu

_LANE = 128
_BLOCK_BYTES = 2 * 1024 * 1024   # ~2 MiB per block


def _copy_kernel(x_ref, o_ref):
    o_ref[...] = x_ref[...]


def _pallas_copy_2d(x2):
    """Lane-dense, row-tiled identity copy of a dense (R, C) slab."""
    R, C = x2.shape
    itemsize = jnp.dtype(x2.dtype).itemsize
    sub = max(8, 32 // itemsize)              # 8 f32 / 16 bf16 / 32 int8 rows

    if R <= sub:
        tr = R                                # "equals full dim" escape hatch
    else:
        tr = max(sub, (_BLOCK_BYTES // (C * itemsize)) // sub * sub)
        tr = min(tr, (R // sub) * sub)        # multiple of `sub`, <= R
    grid = (pl.cdiv(R, tr),)                  # partial last tile is masked

    return pl.pallas_call(
        _copy_kernel,
        out_shape=jax.ShapeDtypeStruct((R, C), x2.dtype),
        grid=grid,
        in_specs=[pl.BlockSpec((tr, C), lambda i: (i, 0))],
        out_specs=pl.BlockSpec((tr, C), lambda i: (i, 0)),
        compiler_params=pltpu.CompilerParams(
            dimension_semantics=("parallel",)),
        cost_estimate=pl.CostEstimate(
            flops=0, transcendentals=0,
            bytes_accessed=2 * R * C * itemsize),
    )(x2)


def _pallas_copy_batch_major(x2):
    """Fallback (total elements not a multiple of 128): copy the (B, N) view
    directly with a cdiv grid; the last lane-tile is a masked store."""
    B, N = x2.shape
    itemsize = jnp.dtype(x2.dtype).itemsize
    if N < _LANE:
        tn = N                                # full-dim escape hatch
    else:
        budget = max(_LANE,
                     (_BLOCK_BYTES // max(1, B * itemsize)) // _LANE * _LANE)
        tn = min((N // _LANE) * _LANE, budget)
    grid = (pl.cdiv(N, tn),)

    return pl.pallas_call(
        _copy_kernel,
        out_shape=jax.ShapeDtypeStruct((B, N), x2.dtype),
        grid=grid,
        in_specs=[pl.BlockSpec((B, tn), lambda i: (0, i))],
        out_specs=pl.BlockSpec((B, tn), lambda i: (0, i)),
        compiler_params=pltpu.CompilerParams(
            dimension_semantics=("parallel",)),
        cost_estimate=pl.CostEstimate(
            flops=0, transcendentals=0,
            bytes_accessed=2 * B * N * itemsize),
    )(x2)


def flatten_forward(x):
    """x: (B, ...) -> (B, prod(rest)); same semantics as x.view(B, -1)."""
    B = x.shape[0]
    N = 1
    for d in x.shape[1:]:
        N *= d
    total = B * N

    # The flatten itself is a metadata-only, row-major reshape (== torch .view).
    flat = x.reshape(total)

    # Largest lane-dense column count C (multiple of 128, <= 4096) dividing the
    # total element count -> copy runs on a dense (total // C, C) slab with
    # full sublane/lane packing regardless of how small B is.
    C = 0
    if total >= _LANE:
        c = min(4096, (total // _LANE) * _LANE)
        while c >= _LANE:
            if total % c == 0:
                C = c
                break
            c -= _LANE

    if C > 0:
        out = _pallas_copy_2d(flat.reshape(total // C, C))
    else:
        out = _pallas_copy_batch_major(flat.reshape(B, N))
    return out.reshape(B, N)


if __name__ == "__main__":
    key = jax.random.PRNGKey(0)
    x = jax.random.normal(key, (2, 4, 16, 16), jnp.float32)   # NCHW, like PyTorch

    y = flatten_forward(x)
    jax.block_until_ready(y)

    # Semantics check: identical to x.view(B, -1)
    ref = x.reshape(x.shape[0], -1)
    assert y.shape == (2, 4 * 16 * 16), y.shape
    assert y.dtype == x.dtype
    assert jnp.array_equal(y, ref)
    print("KERNEL_OK")
</pallas_src>

<mosaic_0001>
module attributes {stable_mosaic.version = 11 : i64} {
  func.func @_copy_kernel(%arg0: i32, %arg1: memref<1x2048xf32, #tpu.memory_space<vmem>>, %arg2: memref<1x2048xf32, #tpu.memory_space<vmem>>) attributes {dimension_semantics = [#tpu.dimension_semantics<parallel>], iteration_bounds = array<i64: 1>, scalar_prefetch = 0 : i64, scratch_operands = 0 : i64, tpu.core_type = #tpu.core_type<tc>, window_params = [{transform_indices = @transform_0, window_bounds = array<i64: 1, 2048>}, {transform_indices = @transform_1, window_bounds = array<i64: 1, 2048>}]} {
    %c0 = arith.constant 0 : index
    %c0_0 = arith.constant 0 : index
    %0 = vector.load %arg1[%c0, %c0_0] : memref<1x2048xf32, #tpu.memory_space<vmem>>, vector<1x2048xf32>
    %c0_1 = arith.constant 0 : index
    %c0_2 = arith.constant 0 : index
    %1 = vector.load %arg2[%c0_1, %c0_2] : memref<1x2048xf32, #tpu.memory_space<vmem>>, vector<1x2048xf32>
    tpu.vector_store %arg2[%c0_1, %c0_2], %0 {strides = array<i32>} : memref<1x2048xf32, #tpu.memory_space<vmem>>, vector<1x2048xf32>,
    return
  }
  func.func @transform_0(%arg0: i32) -> (i32, i32) {
    %c0_i32 = arith.constant 0 : i32
    %c0_i32_0 = arith.constant 0 : i32
    return %arg0, %c0_i32 : i32, i32
  }
  func.func @transform_1(%arg0: i32) -> (i32, i32) {
    %c0_i32 = arith.constant 0 : i32
    %c0_i32_0 = arith.constant 0 : i32
    return %arg0, %c0_i32 : i32, i32
  }
}

</mosaic_0001>

<bundles_post_ra>
// kernel: tpu_custom_call.1
= control target key start
LH: loop header
LB: loop body
LE: loop exit
PB: predicated region body
PF: predicated region fallthrough
CT: control target
= control target key end

     0   :  { %6 = vsyncpa [#allocation3], 0  ;;  %s116_s0 = inlined_call_operand.hbm [shape: f32[1,2048], index: 0, kind: input, shape index: {}]   ;;  %s117_s1 = inlined_call_operand.hbm [shape: f32[1,2048], index: 1, kind: output, shape index: {}]  }
   0x1   :  { %7 = vsyncpa [#allocation4], 0  ;;  %s13_s8 = sshll.u32 %s116_s0, 4  ;;  %s98_s9 = smov [#allocation2]   ;;  %s14_s8 = int_to_ptr.hbm [resolvable:$true] %s13_s8 }
   0x2   :  { %s15_s10 = sshll.u32 %s98_s9, 4  ;;  %s16_s10 = int_to_ptr.vmem [resolvable:$true] %s15_s10 }
   0x3   :  { %18 = dma.hbm_to_vmem [thread:$0]  %s14_s8, 256, %s16_s10, [#allocation3]  }
   0x4   :  { %94 = dma.done.wait [#allocation3], 256  }
   0x5   :  { %95 = vsyncadd [#allocation3], 4294967040  ;;  %s99_s11 = smov [#allocation5]   ;;  %s34_s15 = sshll.u32 %s117_s1, 4  ;;  %v23_v0 = vld [vmem:[#allocation2] sm:$0xff]  ;;  %v24_v1 = vld [vmem:[#allocation2 + $0x8] sm:$0xff]  ;;  %s35_s15 = int_to_ptr.hbm [resolvable:$true] %s34_s15 }
   0x6   :  { %s32_s12 = sshll.u32 %s99_s11, 4  ;;  %25 = vst [vmem:[#allocation5] sm:$0xff] %v23_v0  ;;  %s33_s12 = int_to_ptr.vmem [resolvable:$true] %s32_s12 }
   0x7   :  { %26 = vst [vmem:[#allocation5 + $0x8] sm:$0xff] %v24_v1 }
   0x8   :  { %37 = dma.vmem_to_hbm [thread:$0]  %s33_s12, 256, %s35_s15, [#allocation4]  }
   0x9   :  { %96 = dma.done.wait [#allocation4], 256  }
   0xa   :  { %97 = vsyncadd [#allocation4], 4294967040 }
   0xb   :  { %42 = vsyncpa [#allocation3], 1 }
   0xc   :  { %43 = vsyncpa [#allocation4], 1 }

</bundles_post_ra>
